<compile_context>
chip_gen: v6e
topology: v6e:2x2x1
jax: 0.10.0
libtpu: 0.0.40
codegen_flags: <defaults>
</compile_context>

<pallas_src>
import jax
import jax.numpy as jnp
from jax.experimental import pallas as pl
from jax.experimental.pallas import tpu as pltpu


def _round_up(x, m):
    return (x + m - 1) // m * m


def _round_down(x, m):
    return max(m, x // m * m)


def _largest_aligned_divisor(total, limit, align):
    """Largest multiple of `align` that divides `total` and is <= limit."""
    k = min(limit, total) // align * align
    while k >= align:
        if total % k == 0:
            return k
        k -= align
    return None


def _vmem_budget():
    """Generation-aware (tile_budget, vmem_limit) in bytes."""
    try:
        cap = int(pltpu.get_tpu_info().vmem_capacity_bytes)
    except Exception:
        cap = 64 * 1024 * 1024  # conservative fallback (v7x per-core VMEM)
    # ~100 MiB on v5e/v6e (128 MiB physical), ~50 MiB on v7x (64 MiB physical).
    vmem_limit = min(int(cap * 0.78), cap - 8 * 1024 * 1024)
    tile_budget = int(vmem_limit * 0.85)
    return tile_budget, vmem_limit


# ---------------------------------------------------------------------------
# Kernels
# ---------------------------------------------------------------------------
def _ffn_kernel_single(x_ref, w1_ref, b1_ref, w2_ref, b2_ref, o_ref):
    # Resident-weights fast path: whole d_ff in one pass, no scratch.
    h = jnp.dot(x_ref[...], w1_ref[...], preferred_element_type=jnp.float32)
    h = jnp.maximum(h + b1_ref[...], 0.0)                 # bias + ReLU in f32
    out = jnp.dot(h.astype(w2_ref.dtype), w2_ref[...],
                  preferred_element_type=jnp.float32)
    o_ref[...] = (out + b2_ref[...]).astype(o_ref.dtype)


def _ffn_kernel_multi(x_ref, w1_ref, b1_ref, w2_ref, b2_ref, o_ref, acc_ref):
    # d_ff is tiled on grid axis 1 (>= 2 steps guaranteed by the wrapper) and
    # reduced into the f32 VMEM accumulator; the final step fuses the last
    # partial product + b2 directly into the output store.
    j = pl.program_id(1)
    nj = pl.num_programs(1)

    h = jnp.dot(x_ref[...], w1_ref[...], preferred_element_type=jnp.float32)
    h = jnp.maximum(h + b1_ref[...], 0.0)                 # bias + ReLU in f32
    p = jnp.dot(h.astype(w2_ref.dtype), w2_ref[...],
                preferred_element_type=jnp.float32)

    @pl.when(j == 0)
    def _():
        acc_ref[...] = p

    @pl.when(jnp.logical_and(j > 0, j < nj - 1))
    def _():
        acc_ref[...] += p

    @pl.when(j == nj - 1)
    def _():
        o_ref[...] = (acc_ref[...] + p + b2_ref[...]).astype(o_ref.dtype)


# ---------------------------------------------------------------------------
# Tiling
# ---------------------------------------------------------------------------
def _pick_tiles(n, d_model, d_ff, itemsize, tm, tff, budget):
    # Sublane packing: 8 rows (f32) / 16 (bf16) / 32 (8-bit) per vreg.
    row_align = {4: 8, 2: 16, 1: 32}.get(itemsize, 8)

    # ---- tm first: weight HBM traffic scales with ceil(n/tm). ----
    auto_tm = tm is None
    if auto_tm:
        tff_min = min(d_ff, 256)
        per_row = (4 * d_model * itemsize      # x + out blocks, double-buffered
                   + 4 * d_model               # f32 accumulator row
                   + 4 * tff_min)              # f32 h tile (one d_ff slab)
        w_min = 4 * d_model * tff_min * itemsize   # minimal W1 col + W2 row, x2
        tm = max((budget - w_min) // per_row, row_align)
        tm = min(tm, 1024)

    if n <= tm:
        if auto_tm and n >= 1024:
            # Keep >= 2 row tiles so the "parallel" axis can shard across
            # TensorCores (v7x megacore); skipped for small n.
            tm = _round_up(-(-n // 2), 256)
        else:
            tm = n                              # full-dim block: always legal
    elif auto_tm and tm >= 256:
        tm = _round_down(tm, 256)               # 256x256 MXU alignment
    else:
        tm = _round_down(tm, row_align)

    # ---- tff from what is left of the budget. ----
    fixed = 4 * tm * d_model * itemsize + 4 * tm * d_model
    per_col = 4 * d_model * itemsize + 4 * tm + 2 * itemsize
    if tff is None:
        tff_cap = max((budget - fixed) // per_col, 128)
    else:
        tff_cap = max(tff, 1)

    if d_ff <= tff_cap:
        return tm, d_ff                         # resident-weights single pass

    if tff is not None:
        return tm, tff                          # honor explicit user tile

    # Prefer aligned divisors of d_ff -> no weight padding needed.
    for align in (256, 128):
        t = _largest_aligned_divisor(d_ff, tff_cap, align)
        if t is not None:
            return tm, t
    # Rare fallback (d_ff has no aligned divisor under the cap): pad weights.
    return tm, _round_down(min(tff_cap, 2048), 128)


# ---------------------------------------------------------------------------
# Wrapper
# ---------------------------------------------------------------------------
def position_wise_feed_forward(x, w1, b1, w2, b2, *, tm=None, tff=None,
                               compute_dtype=None):
    """relu(x @ w1 + b1) @ w2 + b2 applied to the last dim of x.

    x:  (..., d_model)
    w1: (d_model, d_ff)   b1: (d_ff,) or (1, d_ff)
    w2: (d_ff, d_model)   b2: (d_model,) or (1, d_model)
    Weights are the transpose of nn.Linear.weight. For best MXU rate / halved
    weight DMA pass compute_dtype=jnp.bfloat16 (accumulation stays f32; the
    output keeps x's original dtype).
    """
    orig_dtype = x.dtype
    *lead, d_model = x.shape
    d_ff = w1.shape[1]
    n = 1
    for s in lead:
        n *= s

    if compute_dtype is not None:
        x = x.astype(compute_dtype)
        w1 = w1.astype(compute_dtype)
        w2 = w2.astype(compute_dtype)

    x2d = x.reshape(n, d_model)
    b1 = b1.reshape(1, d_ff).astype(jnp.float32)       # biases added in f32
    b2 = b2.reshape(1, d_model).astype(jnp.float32)

    itemsize = x2d.dtype.itemsize
    budget, vmem_limit = _vmem_budget()
    tm, tff = _pick_tiles(n, d_model, d_ff, itemsize, tm, tff, budget)

    # Rare fallback only: tff does not divide d_ff -> zero-pad (exact, since
    # padded columns contribute relu(0) @ 0 == 0).
    d_ff_p = _round_up(d_ff, tff)
    if d_ff_p != d_ff:
        pad = d_ff_p - d_ff
        w1 = jnp.pad(w1, ((0, 0), (0, pad)))
        b1 = jnp.pad(b1, ((0, 0), (0, pad)))
        w2 = jnp.pad(w2, ((0, pad), (0, 0)))

    row_tiles = -(-n // tm)
    single = d_ff_p == tff
    w_bytes = w1.size * w1.dtype.itemsize + w2.size * w2.dtype.itemsize
    cost = pl.CostEstimate(
        flops=2 * n * d_model * d_ff * 2,
        transcendentals=0,
        bytes_accessed=(2 * n * d_model * itemsize
                        + (1 if single else row_tiles) * w_bytes
                        + (b1.size + b2.size) * 4),
    )

    if single:
        # Weights fit the VMEM budget: 1-D grid over row tiles, constant-index
        # full-weight blocks (DMA'd once, resident), no accumulator scratch.
        grid_spec = pltpu.PrefetchScalarGridSpec(
            num_scalar_prefetch=0,
            grid=(row_tiles,),
            in_specs=[
                pl.BlockSpec((tm, d_model), lambda i: (i, 0)),       # x rows
                pl.BlockSpec((d_model, d_ff_p), lambda i: (0, 0)),   # W1 (all)
                pl.BlockSpec((1, d_ff_p), lambda i: (0, 0)),         # b1
                pl.BlockSpec((d_ff_p, d_model), lambda i: (0, 0)),   # W2 (all)
                pl.BlockSpec((1, d_model), lambda i: (0, 0)),        # b2
            ],
            out_specs=pl.BlockSpec((tm, d_model), lambda i: (i, 0)),
            scratch_shapes=[],
        )
        kernel = _ffn_kernel_single
        dims = ("parallel",)
    else:
        # d_ff streamed on the innermost ("arbitrary") grid axis, reduced into
        # an f32 VMEM accumulator resident across that axis.
        grid_spec = pltpu.PrefetchScalarGridSpec(
            num_scalar_prefetch=0,
            grid=(row_tiles, d_ff_p // tff),
            in_specs=[
                pl.BlockSpec((tm, d_model), lambda i, j: (i, 0)),    # x rows
                pl.BlockSpec((d_model, tff), lambda i, j: (0, j)),   # W1 tile
                pl.BlockSpec((1, tff), lambda i, j: (0, j)),         # b1 tile
                pl.BlockSpec((tff, d_model), lambda i, j: (j, 0)),   # W2 tile
                pl.BlockSpec((1, d_model), lambda i, j: (0, 0)),     # b2
            ],
            out_specs=pl.BlockSpec((tm, d_model), lambda i, j: (i, 0)),
            scratch_shapes=[pltpu.VMEM((tm, d_model), jnp.float32)],
        )
        kernel = _ffn_kernel_multi
        dims = ("parallel", "arbitrary")

    out2d = pl.pallas_call(
        kernel,
        out_shape=jax.ShapeDtypeStruct((n, d_model), orig_dtype),
        grid_spec=grid_spec,
        compiler_params=pltpu.CompilerParams(
            dimension_semantics=dims,
            vmem_limit_bytes=vmem_limit,
        ),
        cost_estimate=cost,
    )(x2d, w1, b1, w2, b2)

    return out2d.reshape(*lead, d_model)


def _init_params(key, d_model, d_ff, dtype=jnp.float32):
    # Deterministic init matching nn.Linear shapes (stored transposed):
    #   fc1.weight: (d_ff, d_model) -> w1: (d_model, d_ff)
    #   fc2.weight: (d_model, d_ff) -> w2: (d_ff, d_model)
    k1, k2, k3, k4 = jax.random.split(key, 4)
    bound1 = 1.0 / (d_model ** 0.5)
    bound2 = 1.0 / (d_ff ** 0.5)
    w1 = jax.random.uniform(k1, (d_model, d_ff), dtype, -bound1, bound1)
    b1 = jax.random.uniform(k2, (1, d_ff), dtype, -bound1, bound1)
    w2 = jax.random.uniform(k3, (d_ff, d_model), dtype, -bound2, bound2)
    b2 = jax.random.uniform(k4, (1, d_model), dtype, -bound2, bound2)
    return w1, b1, w2, b2


if __name__ == "__main__":
    key = jax.random.PRNGKey(0)
    kx, kp = jax.random.split(key)

    # Small but lane-dense demo shapes (d_model is a multiple of 128).
    batch, seq, d_model, d_ff = 2, 8, 128, 256
    x = jax.random.normal(kx, (batch, seq, d_model), dtype=jnp.float32)
    w1, b1, w2, b2 = _init_params(kp, d_model, d_ff)

    # Pure-JAX reference.
    ref = jnp.maximum(x @ w1 + b1.reshape(-1), 0.0) @ w2 + b2.reshape(-1)

    # 1) Explicit small tiles: exercises the multi-step d_ff-reduction path
    #    (2 row tiles x 2 d_ff steps into the f32 accumulator).
    out = position_wise_feed_forward(x, w1, b1, w2, b2, tm=8, tff=128)
    out = jax.block_until_ready(out)
    assert out.shape == (batch, seq, d_model)
    assert jnp.allclose(out, ref, atol=1e-3, rtol=1e-3), (
        float(jnp.max(jnp.abs(out - ref))))

    # 2) Auto tiles: exercises the resident-weights single-pass fast path.
    out2 = position_wise_feed_forward(x, w1, b1, w2, b2)
    out2 = jax.block_until_ready(out2)
    assert jnp.allclose(out2, ref, atol=1e-3, rtol=1e-3), (
        float(jnp.max(jnp.abs(out2 - ref))))

    # 3) bf16 compute path (production recommendation: full-rate MXU, halved
    #    weight DMA). Accumulation stays f32; tolerance is loose accordingly.
    out3 = position_wise_feed_forward(x, w1, b1, w2, b2,
                                      compute_dtype=jnp.bfloat16)
    out3 = jax.block_until_ready(out3)
    assert jnp.allclose(out3, ref, atol=1e-1, rtol=1e-1), (
        float(jnp.max(jnp.abs(out3 - ref))))

    print("KERNEL_OK")
</pallas_src>

<mosaic_0001>
module attributes {stable_mosaic.version = 11 : i64} {
  func.func @_ffn_kernel_multi(%arg0: i32, %arg1: i32, %arg2: memref<8x128xf32, #tpu.memory_space<vmem>>, %arg3: memref<128x128xf32, #tpu.memory_space<vmem>>, %arg4: memref<1x128xf32, #tpu.memory_space<vmem>>, %arg5: memref<128x128xf32, #tpu.memory_space<vmem>>, %arg6: memref<1x128xf32, #tpu.memory_space<vmem>>, %arg7: memref<8x128xf32, #tpu.memory_space<vmem>>, %arg8: memref<8x128xf32, #tpu.memory_space<vmem>>) attributes {dimension_semantics = [#tpu.dimension_semantics<parallel>, #tpu.dimension_semantics<arbitrary>], iteration_bounds = array<i64: 2, 2>, scalar_prefetch = 0 : i64, scratch_operands = 1 : i64, tpu.core_type = #tpu.core_type<tc>, window_params = [{transform_indices = @transform_0, window_bounds = array<i64: 8, 128>}, {transform_indices = @transform_1, window_bounds = array<i64: 128, 128>}, {transform_indices = @transform_2, window_bounds = array<i64: 1, 128>}, {transform_indices = @transform_3, window_bounds = array<i64: 128, 128>}, {pipeline_mode = #tpu.pipeline_mode<synchronous>, transform_indices = @transform_4, window_bounds = array<i64: 1, 128>}, {transform_indices = @transform_5, window_bounds = array<i64: 8, 128>}]} {
    %c0 = arith.constant 0 : index
    %c0_0 = arith.constant 0 : index
    %0 = vector.load %arg2[%c0, %c0_0] : memref<8x128xf32, #tpu.memory_space<vmem>>, vector<8x128xf32>
    %c0_1 = arith.constant 0 : index
    %c0_2 = arith.constant 0 : index
    %1 = vector.load %arg3[%c0_1, %c0_2] : memref<128x128xf32, #tpu.memory_space<vmem>>, vector<128x128xf32>
    %cst = arith.constant dense<0.000000e+00> : vector<8x128xf32>
    %2 = tpu.matmul %0, %1, %cst {dimension_numbers = #tpu.dot_dimension_numbers<[1], [0], [0], [1], [0, 0, 1, 1], [], []>} : vector<8x128xf32>, vector<128x128xf32>, vector<8x128xf32> -> vector<8x128xf32>
    %c0_3 = arith.constant 0 : index
    %c0_4 = arith.constant 0 : index
    %3 = vector.load %arg4[%c0_3, %c0_4] : memref<1x128xf32, #tpu.memory_space<vmem>>, vector<1x128xf32>
    %4 = vector.broadcast %3 : vector<1x128xf32> to vector<8x128xf32>
    %5 = arith.addf %2, %4 : vector<8x128xf32>
    %cst_5 = arith.constant 0.000000e+00 : f32
    %6 = vector.broadcast %cst_5 : f32 to vector<8x128xf32>
    %7 = arith.maximumf %5, %6 : vector<8x128xf32>
    %c0_6 = arith.constant 0 : index
    %c0_7 = arith.constant 0 : index
    %8 = vector.load %arg5[%c0_6, %c0_7] : memref<128x128xf32, #tpu.memory_space<vmem>>, vector<128x128xf32>
    %cst_8 = arith.constant dense<0.000000e+00> : vector<8x128xf32>
    %9 = tpu.matmul %7, %8, %cst_8 {dimension_numbers = #tpu.dot_dimension_numbers<[1], [0], [0], [1], [0, 0, 1, 1], [], []>} : vector<8x128xf32>, vector<128x128xf32>, vector<8x128xf32> -> vector<8x128xf32>
    %c0_i32 = arith.constant 0 : i32
    %10 = arith.cmpi eq, %arg1, %c0_i32 : i32
    %11 = arith.extui %10 : i1 to i32
    %c0_i32_9 = arith.constant 0 : i32
    %12 = arith.cmpi ne, %11, %c0_i32_9 : i32
    scf.if %12 {
      %c0_14 = arith.constant 0 : index
      %c0_15 = arith.constant 0 : index
      %21 = vector.load %arg8[%c0_14, %c0_15] : memref<8x128xf32, #tpu.memory_space<vmem>>, vector<8x128xf32>
      tpu.vector_store %arg8[%c0_14, %c0_15], %9 {strides = array<i32>} : memref<8x128xf32, #tpu.memory_space<vmem>>, vector<8x128xf32>,
    } else {
    }
    %c0_i32_10 = arith.constant 0 : i32
    %13 = arith.cmpi sgt, %arg1, %c0_i32_10 : i32
    %c1_i32 = arith.constant 1 : i32
    %14 = arith.cmpi slt, %arg1, %c1_i32 : i32
    %15 = arith.andi %13, %14 : i1
    %16 = arith.extui %15 : i1 to i32
    %c0_i32_11 = arith.constant 0 : i32
    %17 = arith.cmpi ne, %16, %c0_i32_11 : i32
    scf.if %17 {
      %c0_14 = arith.constant 0 : index
      %c0_15 = arith.constant 0 : index
      %21 = vector.load %arg8[%c0_14, %c0_15] : memref<8x128xf32, #tpu.memory_space<vmem>>, vector<8x128xf32>
      %22 = arith.addf %21, %9 : vector<8x128xf32>
      %c0_16 = arith.constant 0 : index
      %c0_17 = arith.constant 0 : index
      %23 = vector.load %arg8[%c0_16, %c0_17] : memref<8x128xf32, #tpu.memory_space<vmem>>, vector<8x128xf32>
      tpu.vector_store %arg8[%c0_16, %c0_17], %22 {strides = array<i32>} : memref<8x128xf32, #tpu.memory_space<vmem>>, vector<8x128xf32>,
    } else {
    }
    %c1_i32_12 = arith.constant 1 : i32
    %18 = arith.cmpi eq, %arg1, %c1_i32_12 : i32
    %19 = arith.extui %18 : i1 to i32
    %c0_i32_13 = arith.constant 0 : i32
    %20 = arith.cmpi ne, %19, %c0_i32_13 : i32
    scf.if %20 {
      %c0_14 = arith.constant 0 : index
      %c0_15 = arith.constant 0 : index
      %21 = vector.load %arg8[%c0_14, %c0_15] : memref<8x128xf32, #tpu.memory_space<vmem>>, vector<8x128xf32>
      %22 = arith.addf %21, %9 : vector<8x128xf32>
      %c0_16 = arith.constant 0 : index
      %c0_17 = arith.constant 0 : index
      %23 = vector.load %arg6[%c0_16, %c0_17] : memref<1x128xf32, #tpu.memory_space<vmem>>, vector<1x128xf32>
      %24 = vector.broadcast %23 : vector<1x128xf32> to vector<8x128xf32>
      %25 = arith.addf %22, %24 : vector<8x128xf32>
      %c0_18 = arith.constant 0 : index
      %c0_19 = arith.constant 0 : index
      %26 = vector.load %arg7[%c0_18, %c0_19] : memref<8x128xf32, #tpu.memory_space<vmem>>, vector<8x128xf32>
      tpu.vector_store %arg7[%c0_18, %c0_19], %25 {strides = array<i32>} : memref<8x128xf32, #tpu.memory_space<vmem>>, vector<8x128xf32>,
    } else {
    }
    return
  }
  func.func @transform_0(%arg0: i32, %arg1: i32) -> (i32, i32) {
    %c0_i32 = arith.constant 0 : i32
    %c0_i32_0 = arith.constant 0 : i32
    return %arg0, %c0_i32 : i32, i32
  }
  func.func @transform_1(%arg0: i32, %arg1: i32) -> (i32, i32) {
    %c0_i32 = arith.constant 0 : i32
    %c0_i32_0 = arith.constant 0 : i32
    return %c0_i32, %arg1 : i32, i32
  }
  func.func @transform_2(%arg0: i32, %arg1: i32) -> (i32, i32) {
    %c0_i32 = arith.constant 0 : i32
    %c0_i32_0 = arith.constant 0 : i32
    return %c0_i32, %arg1 : i32, i32
  }
  func.func @transform_3(%arg0: i32, %arg1: i32) -> (i32, i32) {
    %c0_i32 = arith.constant 0 : i32
    %c0_i32_0 = arith.constant 0 : i32
    return %arg1, %c0_i32 : i32, i32
  }
  func.func @transform_4(%arg0: i32, %arg1: i32) -> (i32, i32) {
    %c0_i32 = arith.constant 0 : i32
    %c0_i32_0 = arith.constant 0 : i32
    %c0_i32_1 = arith.constant 0 : i32
    return %c0_i32, %c0_i32_0 : i32, i32
  }
  func.func @transform_5(%arg0: i32, %arg1: i32) -> (i32, i32) {
    %c0_i32 = arith.constant 0 : i32
    %c0_i32_0 = arith.constant 0 : i32
    return %arg0, %c0_i32 : i32, i32
  }
}

</mosaic_0001>

<bundles_post_ra>
// kernel: tpu_custom_call.1
= control target key start
LH: loop header
LB: loop body
LE: loop exit
PB: predicated region body
PF: predicated region fallthrough
CT: control target
= control target key end

     0   :  { %s1550_s0 = inlined_call_operand.hbm [shape: f32[16,128], index: 0, kind: input, shape index: {}]   ;;  %s1551_s1 = inlined_call_operand.hbm [shape: f32[128,256], index: 1, kind: input, shape index: {}]   ;;  %s1552_s2 = inlined_call_operand.vmem [shape: f32[1,256], index: 2, kind: input, shape index: {}]   ;;  %s1553_s3 = inlined_call_operand.hbm [shape: f32[256,128], index: 3, kind: input, shape index: {}]   ;;  %s1554_s4 = inlined_call_operand.vmem [shape: f32[1,128], index: 4, kind: input, shape index: {}]   ;;  %s1555_s5 = inlined_call_operand.hbm [shape: f32[16,128], index: 5, kind: output, shape index: {}]  }
   0x1   :  { %1565 = sst [smem:[#allocation20_spill]] %s1550_s0 }
   0x2   :  { %1566 = sst [smem:[#allocation21_spill]] %s1551_s1 }
   0x3   :  { %1567 = sst [smem:[#allocation22_spill]] %s1552_s2 }
   0x4   :  { %1568 = sst [smem:[#allocation23_spill]] %s1554_s4 }
   0x5   :  { %1569 = sst [smem:[#allocation24_spill]] %s1555_s5 }
   0x6   :  { %10 = vsyncpa [#allocation4], 0 }
   0x7   :  { %12 = vsyncpa [#allocation4 + $0x1], 0 }
   0x8   :  { %13 = vsyncpa [#allocation7], 0 }
   0x9   :  { %15 = vsyncpa [#allocation7 + $0x1], 0 }
   0xa   :  { %16 = vsyncpa [#allocation5], 0 }
   0xb   :  { %18 = vsyncpa [#allocation5 + $0x1], 0  ;;  %s1195_s18 = smov 0   ;;  %s1197_s19 = smov 0  }
   0xc   :  { %s1199_s20 = smov 0   ;;  %s1201_s21 = smov 0  }
   0xd   :  { %s1203_s22 = smov 0   ;;  %s1205_s23 = smov 0  }
   0xe   :  { %s1207_s24 = smov 0   ;;  %s1209_s25 = smov 0  }
   0xf   :  { %s1211_s26 = smov 0   ;;  %s1213_s27 = smov 0  }
  0x10   :  { %s1215_s28 = smov 0  }
  0x11 LB: > { %1570 = sst [smem:[#allocation13_spill]] %s1134_s23  ;;  %p51_p0 = scmp.eq.s32.totalorder %s1154_s28, 0  ;;  %s1154_s28 = sphi %s1215_s28, %s24_s28   ;;  %s1150_s27 = sphi %s1213_s27, %s1602_s27   ;;  %s1146_s26 = sphi %s1211_s26, %s1609_s26   ;;  %s1142_s25 = sphi %s1209_s25, %s1600_s25   ;;  %s1138_s24 = sphi %s1207_s24, %s1608_s24   ;;  %s1134_s23 = sphi %s1205_s23, %s1599_s23   ;;  %s1130_s22 = sphi %s1203_s22, %s1607_s22   ;;  %s1126_s21 = sphi %s1201_s21, %s1606_s21   ;;  %s1122_s20 = sphi %s1199_s20, %s1605_s20   ;;  %s1118_s19 = sphi %s1197_s19, %s1604_s19   ;;  %s1114_s18 = sphi %s1195_s18, %s1603_s18  }
  0x12   : > { %1571 = sst [smem:[#allocation14_spill]] %s1142_s25  ;;  %p76_p1 = scmp.ne.s32.totalorder %s1122_s20, %s1118_s19 }
  0x13   : > { %1572 = sst [smem:[#allocation15_spill]] %s1150_s27  ;;  %p1561_p2 = scmp.lt.s32.totalorder %s1154_s28, 4 }
  0x14   : > { %s226_s30 = sand.u32 1, %s1154_s28   ;;  %p78_p3 = por %p76_p1, %p51_p0 }
  0x15   : > { %s228_s6 = sand.u32 1, %s1122_s20   ;;  %s707_s7 = sshll.u32 %s1146_s26, 7 }
  0x16   : > { %s1260_s8 = sshll.u32 %s228_s6, 7  ;;  %s1573_s1 = sld [smem:[#allocation21_spill]] }
  0x17   : > { %p1267_p4 = pnand %p1561_p2, %p78_p3  ;;  %s230_s13 = scalar_lea.vmem [#allocation6], %s1260_s8 }
  0x18   : > { %s236_s14 = sshll.u32 %s230_s13, 4  ;;  %s1272_s15 = scalar_lea.sflag [#allocation7], %s226_s30  ;;  %s237_s14 = int_to_ptr.vmem [resolvable:$true] %s236_s14 }
  0x19   : > { %p1558_p5 = pneg %p1267_p4  ;;  %s959_s16 = scalar_lea.vmem %s237_s14, 2048 }
  0x1a   : > { %p960_p6 = scmp.ne.s32.totalorder %s237_s14, %s959_s16  ;;  %s1156_s17 = smov [#allocation6]  }
  0x1b   : > { %s964_s6 = sshll.u32 %s1156_s17, 4  ;;  %s965_s6 = int_to_ptr.vmem [resolvable:$false] %s964_s6 }
  0x1c   : > { %s235_s11 = scalar_lea.hbm %s1573_s1, %s707_s7  ;;  %p962_p7 = pnand %p960_p6, %p1558_p5 }
  0x1d   : > { %s966_s7 = scalar_lea.vmem %s965_s6, 4096  ;;  %p967_p9 = scmp.lt.s32.totalorder %s237_s14, %s965_s6 }
  0x1e   : > { %p963_p8 = pneg %p962_p7  ;;  %p968_p10 = scmp.lt.s32.totalorder %s966_s7, %s959_s16 }
  0x20   : > { %p969_p11 = por %p968_p10, %p967_p9 }
  0x22   : > { %p970_p12 = pnand %p969_p11, %p963_p8 }
  0x24   : > { %973 = shalt.err (!%p970_p12)
}
  0x25   : > { %s1157_s9 = smov 256   ;;  %s1556_s30 = smov 128  }
  0x26   : > { %s1557_s10 = smov 8   ;;  %p711_p13 = scmp.ge.s32.totalorder %s1154_s28, 1 }
  0x27   : > { %843 = dma.hbm_to_vmem [thread:$0]  (!%p1267_p4), %s235_s11, 2048, %s237_s14, %s1272_s15, %s1157_s9, %s1556_s30, %s1557_s10  }
  0x28   : > { %p271_p1 = scmp.lt.s32.totalorder %s1154_s28, 5  ;;  %s1291_s16 = sadd.s32 4294967295, %s1154_s28  }
  0x29   : > { %s701_s17 = sadd.s32 4294967294, %s1154_s28   ;;  %s33_s6 = sadd.s32 1, %s1146_s26 }
  0x2a   : > { %p1286_p3 = pnand %p711_p13, %p271_p1  ;;  %p34_p6 = scmp.ge.s32.totalorder %s33_s6, 2 }
  0x2b   : > { %s36_s7 = sadd.s32 1, %s1150_s27  ;;  %s43_s11 = sadd.s32 1, %s1134_s23 }
  0x2c   : > { %p50_p7 = scmp.ne.s32.totalorder %s1134_s23, %s1130_s22  ;;  %s1611_s6 = smov (%p34_p6, %s33_s6), 0 }
  0x2d   : > { %1576 = sst [smem:[#allocation16_spill]] %s1611_s6  ;;  %s1613_s7 = smov (!%p34_p6, %s36_s7), %s1150_s27 }
  0x2e   : > { %p1307_p8 = por %p51_p0, %p50_p7  ;;  %p56_p9 = scmp.ne.s32.totalorder %s1130_s22, %s1126_s21 }
  0x2f   : > { %p38_p10 = scmp.ge.s32.totalorder %s1613_s7, 2  ;;  %p57_p11 = scmp.eq.s32.totalorder %s1291_s16, 0 }
  0x30   : > { %s66_s9 = ssub.s32 %s1146_s26, %s1611_s6  ;;  %p82_p12 = scmp.ne.s32.totalorder %s1118_s19, %s1114_s18 }
  0x31   : > { %s1615_s7 = smov (%p38_p10, %s1613_s7), 0  ;;  %p1323_p13 = por %p57_p11, %p56_p9 }
  0x32   : > { %1578 = sst [smem:[#allocation17_spill]] %s1615_s7  ;;  %p67_p0 = scmp.eq.s32.totalorder %s66_s9, 0 }
  0x33   : > { %s40_s10 = ssub.s32 %s1150_s27, %s1615_s7  ;;  %p1329_p1 = por %p82_p12, %p57_p11 }
  0x34   : > { %p41_p6 = scmp.eq.s32.totalorder %s40_s10, 0  ;;  %p179_p5 = scmp.eq.s32.totalorder %s1291_s16, 3 }
  0x35   : > { %s1581_s1 = sadd.s32 1, %s1122_s20  ;;  %p185_p2 = scmp.eq.s32.totalorder %s701_s17, 3 }
  0x36   : > { %s1337_s18 = scalar_select %p67_p0, %s1122_s20, %s1581_s1  }
  0x37   : > { %s1340_s6 = scalar_select %p41_p6, %s1134_s23, %s43_s11  }
  0x38   : > { %1582 = sst [smem:[#allocation18_spill]] %s1337_s18  ;;  %p1345_p10 = por %p179_p5, %p50_p7 }
  0x39   : > { %1583 = sst [smem:[#allocation19_spill]] %s1340_s6  ;;  %s208_s25 = sand.u32 1, %s1134_s23  }
  0x3a   : > { %s705_s9 = sshll.u32 %s1150_s27, 7  ;;  %p1354_p11 = por %p185_p2, %p56_p9 }
  0x3b   : > { %s704_s10 = sshll.u32 %s208_s25, 3  ;;  %s1586_s0 = sld [smem:[#allocation20_spill]] }
  0x3c   : > { %s1585_s7 = scalar_select %p1354_p11, 1, 0 }
  0x3d   : > { %p1587_p12 = scmp.lt.s32.totalorder %s1154_s28, 4  ;;  %s212_s17 = scalar_lea.vmem [#allocation3], %s704_s10 }
  0x3e   : > { %s219_s6 = sshll.u32 %s212_s17, 4  ;;  %s209_s27 = scalar_lea.sflag [#allocation4], %s208_s25  ;;  %s220_s6 = int_to_ptr.vmem [resolvable:$true] %s219_s6 }
  0x3f   : > { %p1365_p0 = pnand %p1587_p12, %p1307_p8  ;;  %s987_s23 = scalar_lea.vmem %s220_s6, 128 }
  0x40   : > { %p988_p5 = scmp.ne.s32.totalorder %s220_s6, %s987_s23  ;;  %s1160_s18 = smov [#allocation3]  }
  0x41   : > { %s217_s1 = scalar_lea.hbm %s1586_s0, %s705_s9  ;;  %p976_p2 = pneg %p1365_p0 }
  0x42   : > { %s992_s2 = sshll.u32 %s1160_s18, 4  ;;  %s993_s2 = int_to_ptr.vmem [resolvable:$false] %s992_s2 }
  0x43   : > { %p990_p7 = pnand %p988_p5, %p976_p2  ;;  %s994_s4 = scalar_lea.vmem %s993_s2, 256 }
  0x44   : > { %p995_p6 = scmp.lt.s32.totalorder %s220_s6, %s993_s2  ;;  %p996_p8 = scmp.lt.s32.totalorder %s994_s4, %s987_s23 }
  0x45   : > { %p991_p9 = pneg %p990_p7 }
  0x46   : > { %p997_p12 = por %p996_p8, %p995_p6 }
  0x48   : > { %p998_p11 = pnand %p997_p12, %p991_p9 }
  0x4a   : > { %1001 = shalt.err (!%p998_p11)
}
  0x4b   : > { %840 = dma.hbm_to_vmem [thread:$0]  (!%p1365_p0), %s217_s1, 128, %s220_s6, %s209_s27  }
  0x4c   : > { %s724_s25 = sshll.u32 %s1146_s26, 11  ;;  %s256_s14 = scalar_lea.vmem [#allocation8], %s1260_s8 }
  0x4d   : > { %s263_s9 = sshll.u32 %s256_s14, 4  ;;  %s262_s18 = scalar_lea.hbm %s1553_s3, %s724_s25  ;;  %s264_s9 = int_to_ptr.vmem [resolvable:$true] %s263_s9 }
  0x4e   : > { %s1015_s0 = scalar_lea.vmem %s264_s9, 2048  ;;  %p1589_p5 = pneg %p1267_p4 }
  0x4f   : > { %p1016_p2 = scmp.ne.s32.totalorder %s264_s9, %s1015_s0  ;;  %s1161_s23 = smov [#allocation8]  }
  0x50   : > { %s1020_s11 = sshll.u32 %s1161_s23, 4  ;;  %s1021_s11 = int_to_ptr.vmem [resolvable:$false] %s1020_s11 }
  0x51   : > { %p1018_p7 = pnand %p1016_p2, %p1589_p5  ;;  %s1022_s2 = scalar_lea.vmem %s1021_s11, 4096 }
  0x52   : > { %p1023_p9 = scmp.lt.s32.totalorder %s264_s9, %s1021_s11  ;;  %p1024_p0 = scmp.lt.s32.totalorder %s1022_s2, %s1015_s0 }
  0x53   : > { %p1019_p11 = pneg %p1018_p7 }
  0x54   : > { %p1025_p6 = por %p1024_p0, %p1023_p9 }
  0x56   : > { %p1026_p8 = pnand %p1025_p6, %p1019_p11 }
  0x58   : > { %1029 = shalt.err (!%p1026_p8)
}
  0x59   : > { %s1590_s27 = smov 8   ;;  %s1591_s8 = smov 128  }
  0x5a   : > { %846 = dma.hbm_to_vmem [thread:$0]  (!%p1267_p4), %s262_s18, 2048, %s264_s9, %s1272_s15, %s1591_s8, %s1591_s8, %s1590_s27  }
  0x5b   : > { %275 = sbr.rel (%p1286_p3) target bundleno = 578 (0x242), region = 40  ;;  %s1390_s6 = sand.u32 (!%p1286_p3), 1, %s1130_s22  }
  0x5c   : > { %s712_s0 = sshll.u32 (!%p1286_p3), %s1390_s6, 3  ;;  %s278_s1 = scalar_lea.sflag (!%p1286_p3), [#allocation4], %s1390_s6 }
  0x5d   : > { %s1396_s4 = scalar_lea.vmem (!%p1286_p3), [#allocation3], %s712_s0 }
  0x60   : > { %1101 = dma.done.wait (%p1323_p13), %s278_s1, 128  }
  0x61   : > { %1103 = vsyncadd (%p1323_p13), %s278_s1, 4294967168  ;;  %s286_s12 = sand.u32 1, %s1291_s16   ;;  %s288_s15 = sand.u32 1, %s1118_s19  }
  0x62   : > { %s713_s13 = sshll.u32 %s288_s15, 7  ;;  %s287_s25 = scalar_lea.sflag [#allocation7], %s286_s12 }
  0x63   : > { %s1404_s14 = scalar_lea.vmem [#allocation6], %s713_s13 }
  0x64   : > { %1105 = dma.done.wait (%p1329_p1), %s287_s25, 4096  }
  0x65   : > { %1107 = vsyncadd (%p1329_p1), %s287_s25, 4294963200  ;;  %v1162_v0 = vmov 0.0   ;;  %vm1163_vm0 = vmmov 0   ;;  %v359_v1 = vld [vmem:[%s1404_s14 + $0x78] sm:$0xff]  ;;  %v358_v2 = vld [vmem:[%s1404_s14 + $0x70] sm:$0xff]  ;;  %s1420_s29 = scalar_lea.vmem [#allocation8], %s713_s13 }
  0x66   : > { %759 = vmatprep.subr.mxu0 %v1162_v0  ;;  %791 = vmatprep.mubr.msk.f32.mxu0 %vm1163_vm0, %v1162_v0  ;;  %v357_v3 = vld [vmem:[%s1404_s14 + $0x68] sm:$0xff]  ;;  %v356_v4 = vld [vmem:[%s1404_s14 + $0x60] sm:$0xff]  ;;  %v453_v5 = vld [vmem:[%s1420_s29 + $0x78] sm:$0xff]  ;;  %p339_p4 = scmp.lt.s32.totalorder %s1138_s24, 1  ;;  %s1592_s10 = sld [smem:[#allocation22_spill]] }
  0x67   : > { %794 = vmatprep.subr.mxu1 %v1162_v0  ;;  %826 = vmatprep.mubr.msk.f32.mxu1 %vm1163_vm0, %v1162_v0  ;;  %v355_v6 = vld [vmem:[%s1404_s14 + $0x58] sm:$0xff]  ;;  %v452_v7 = vld [vmem:[%s1420_s29 + $0x70] sm:$0xff]  ;;  %v451_v8 = vld [vmem:[%s1420_s29 + $0x68] sm:$0xff]  ;;  %s338_s18 = scalar_lea.vmem [#allocation9], %s712_s0  ;;  %p717_p3 = scmp.ne.s32.totalorder %s1138_s24, 0 }
  0x68   : > { %760 = vmatpush3.msra.mxu0 %v359_v1  ;;  %795 = vmatpush3.msra.mxu1 %v453_v5  ;;  %v354_v9 = vld [vmem:[%s1404_s14 + $0x50] sm:$0xff]  ;;  %v450_v10 = vld [vmem:[%s1420_s29 + $0x60] sm:$0xff]  ;;  %v353_v11 = vld [vmem:[%s1404_s14 + $0x48] sm:$0xff]  ;;  %s340_s30 = scalar_select %p339_p4, %s1138_s24, 1 }
  0x69   : > { %761 = vmatprep.subr.mxu0 %v1162_v0  ;;  %796 = vmatprep.subr.mxu1 %v1162_v0  ;;  %v449_v12 = vld [vmem:[%s1420_s29 + $0x58] sm:$0xff]  ;;  %v352_v13 = vld [vmem:[%s1404_s14 + $0x40] sm:$0xff]  ;;  %v448_v14 = vld [vmem:[%s1420_s29 + $0x50] sm:$0xff] }
  0x6a   : > { %762 = vmatpush3.msra.mxu0 %v358_v2  ;;  %797 = vmatpush3.msra.mxu1 %v452_v7  ;;  %v351_v15 = vld [vmem:[%s1404_s14 + $0x38] sm:$0xff]  ;;  %v447_v16 = vld [vmem:[%s1420_s29 + $0x48] sm:$0xff]  ;;  %v350_v17 = vld [vmem:[%s1404_s14 + $0x30] sm:$0xff] }
  0x6b   : > { %763 = vmatprep.subr.mxu0 %v1162_v0  ;;  %798 = vmatprep.subr.mxu1 %v1162_v0  ;;  %v446_v18 = vld [vmem:[%s1420_s29 + $0x40] sm:$0xff]  ;;  %v349_v19 = vld [vmem:[%s1404_s14 + $0x28] sm:$0xff]  ;;  %v445_v20 = vld [vmem:[%s1420_s29 + $0x38] sm:$0xff] }
  0x6c   : > { %764 = vmatpush3.msra.mxu0 %v357_v3  ;;  %799 = vmatpush3.msra.mxu1 %v451_v8  ;;  %v348_v21 = vld [vmem:[%s1404_s14 + $0x20] sm:$0xff]  ;;  %v444_v22 = vld [vmem:[%s1420_s29 + $0x30] sm:$0xff]  ;;  %v347_v23 = vld [vmem:[%s1404_s14 + $0x18] sm:$0xff]  ;;  %s341_s17 = scalar_lea.vmem %s1592_s10, %s340_s30 }
  0x6d   : > { %765 = vmatprep.subr.mxu0 %v1162_v0  ;;  %800 = vmatprep.subr.mxu1 %v1162_v0  ;;  %v443_v24 = vld [vmem:[%s1420_s29 + $0x28] sm:$0xff]  ;;  %v346_v25 = vld [vmem:[%s1404_s14 + $0x10] sm:$0xff]  ;;  %v442_v26 = vld [vmem:[%s1420_s29 + $0x20] sm:$0xff] }
  0x6e   : > { %766 = vmatpush3.msra.mxu0 %v356_v4  ;;  %801 = vmatpush3.msra.mxu1 %v450_v10  ;;  %v345_v27 = vld [vmem:[%s1404_s14 + $0x8] sm:$0xff]  ;;  %v441_v28 = vld [vmem:[%s1420_s29 + $0x18] sm:$0xff]  ;;  %v344_v29 = vld [vmem:[%s1404_s14] sm:$0xff] }
  0x6f   : > { %767 = vmatprep.subr.mxu0 %v1162_v0  ;;  %802 = vmatprep.subr.mxu1 %v1162_v0  ;;  %v343_v30 = vld [vmem:[%s1396_s4] sm:$0xff]  ;;  %v439_v32 = vld [vmem:[%s1420_s29 + $0x8] sm:$0xff]  ;;  %v438_v33 = vld [vmem:[%s1420_s29] sm:$0xff] }
  0x70   : > { %768 = vmatpush3.msra.mxu0 %v355_v6  ;;  %803 = vmatpush3.msra.mxu1 %v449_v12  ;;  %v440_v31 = vld [vmem:[%s1420_s29 + $0x10] sm:$0xff]  ;;  %v716_v34 = vld [vmem:[%s341_s17] ss:$0 sm:$0xff] }
  0x71   : > { %769 = vmatprep.subr.mxu0 %v1162_v0  ;;  %804 = vmatprep.subr.mxu1 %v1162_v0 }
  0x72   : > { %770 = vmatpush3.msra.mxu0 %v354_v9  ;;  %805 = vmatpush3.msra.mxu1 %v448_v14 }
  0x73   : > { %771 = vmatprep.subr.mxu0 %v1162_v0  ;;  %806 = vmatprep.subr.mxu1 %v1162_v0 }
  0x74   : > { %772 = vmatpush3.msra.mxu0 %v353_v11  ;;  %807 = vmatpush3.msra.mxu1 %v447_v16 }
  0x75   : > { %773 = vmatprep.subr.mxu0 %v1162_v0  ;;  %808 = vmatprep.subr.mxu1 %v1162_v0 }
  0x76   : > { %774 = vmatpush3.msra.mxu0 %v352_v13  ;;  %809 = vmatpush3.msra.mxu1 %v446_v18 }
  0x77   : > { %775 = vmatprep.subr.mxu0 %v1162_v0  ;;  %810 = vmatprep.subr.mxu1 %v1162_v0 }
  0x78   : > { %776 = vmatpush3.msra.mxu0 %v351_v15  ;;  %811 = vmatpush3.msra.mxu1 %v445_v20 }
  0x79   : > { %777 = vmatprep.subr.mxu0 %v1162_v0  ;;  %812 = vmatprep.subr.mxu1 %v1162_v0 }
  0x7a   : > { %778 = vmatpush3.msra.mxu0 %v350_v17  ;;  %813 = vmatpush3.msra.mxu1 %v444_v22 }
  0x7b   : > { %779 = vmatprep.subr.mxu0 %v1162_v0  ;;  %814 = vmatprep.subr.mxu1 %v1162_v0 }
  0x7c   : > { %780 = vmatpush3.msra.mxu0 %v349_v19  ;;  %815 = vmatpush3.msra.mxu1 %v443_v24 }
  0x7d   : > { %781 = vmatprep.subr.mxu0 %v1162_v0  ;;  %816 = vmatprep.subr.mxu1 %v1162_v0 }
  0x7e   : > { %782 = vmatpush3.msra.mxu0 %v348_v21  ;;  %817 = vmatpush3.msra.mxu1 %v442_v26 }
  0x7f   : > { %783 = vmatprep.subr.mxu0 %v1162_v0  ;;  %818 = vmatprep.subr.mxu1 %v1162_v0 }
  0x80   : > { %784 = vmatpush3.msra.mxu0 %v347_v23  ;;  %819 = vmatpush3.msra.mxu1 %v441_v28 }
  0x81   : > { %785 = vmatprep.subr.mxu0 %v1162_v0  ;;  %820 = vmatprep.subr.mxu1 %v1162_v0 }
  0x82   : > { %786 = vmatpush3.msra.mxu0 %v346_v25  ;;  %821 = vmatpush3.msra.mxu1 %v440_v31 }
  0x83   : > { %787 = vmatprep.subr.mxu0 %v1162_v0  ;;  %822 = vmatprep.subr.mxu1 %v1162_v0 }
  0x84   : > { %788 = vmatpush3.msra.mxu0 %v345_v27  ;;  %823 = vmatpush3.msra.mxu1 %v439_v32 }
  0x85   : > { %789 = vmatprep.subr.mxu0 %v1162_v0  ;;  %824 = vmatprep.subr.mxu1 %v1162_v0 }
  0x86   : > { %790 = vmatpush3.msra.mxu0 %v344_v29  ;;  %825 = vmatpush3.msra.mxu1 %v438_v33 }
  0x87   : > { %792 = vmatmul.mubr.f32.vlgmr.msra.gmra.mxu0 %v343_v30 }
 0x147   : > { %v433_v35 = vpop.f32.mrf.mxu0 }
 0x148   : > { %v434_v36 = vadd.f32 %v716_v34, %v433_v35 }
 0x149   : > { %v793_v37 = vpop.f32.mrf.mxu0 }
 0x14a   : > { %v437_v38 = vmax.f32 %v434_v36, 0.0 }
 0x14c   : > { %827 = vmatmul.mubr.f32.vlgmr.msra.gmra.mxu1 %v437_v38 }
 0x20a   : > { %527 = sbr.rel (%p717_p3) target bundleno = 528 (0x210), region = 56 }
 0x20c   : > { %v520_v39 = vpop.f32.mrf.mxu1 }
 0x20e   : > { %v828_v40 = vpop.f32.mrf.mxu1 }
 0x20f   : > { %528 = vst [vmem:[#allocation2] sm:$0xff] %v520_v39 }
 0x210 PF: > { %p529_p13 = scmp.gt.s32.totalorder %s1138_s24, 0 }
 0x212   : > { %p531_p1 = pnand %p529_p13, %p339_p4 }
 0x214   : > { %534 = sbr.rel (%p531_p1) target bundleno = 541 (0x21d), region = 60 }
 0x219   : > { %v535_v41 = vld [vmem:[#allocation2] sm:$0xff] }
 0x21a   : > { %v536_v42 = vadd.f32 %v535_v41, %v520_v39 }
 0x21c   : > { %537 = vst [vmem:[#allocation2] sm:$0xff] %v536_v42 }
 0x21d PF: > { %p718_p12 = scmp.ne.s32.totalorder %s1138_s24, 1 }
 0x21e   : > { %s1593_s2 = sld [smem:[#allocation23_spill]] (!%p718_p12) }
 0x21f   : > { %541 = sbr.rel (%p718_p12) target bundleno = 554 (0x22a), region = 64 }
 0x224   : > { %v542_v43 = vld [vmem:[#allocation2] sm:$0xff] }
 0x225   : > { %v719_v44 = vld [vmem:[%s1593_s2] ss:$0 sm:$0xff]  ;;  %v543_v45 = vadd.f32 %v542_v43, %v520_v39 }
 0x227   : > { %v551_v46 = vadd.f32 %v719_v44, %v543_v45 }
 0x229   : > { %552 = vst [vmem:[%s338_s18] sm:$0xff] %v551_v46 }
 0x22a PF: > { %s1594_s27 = sld [smem:[#allocation14_spill]]  ;;  %s567_s15 = sshll.u32 %s338_s18, 4  ;;  %s568_s15 = int_to_ptr.vmem [resolvable:$true] %s567_s15 }
 0x22b   : > { %s1595_s4 = sld [smem:[#allocation24_spill]]  ;;  %s554_s24 = scalar_lea.sflag [#allocation5], %s1390_s6 }
 0x22c   : > { %s1030_s13 = scalar_lea.vmem %s568_s15, 128  ;;  %s1164_s25 = smov [#allocation9]  }
 0x22d   : > { %p1031_p2 = scmp.ne.s32.totalorder %s568_s15, %s1030_s13  ;;  %s1034_s14 = sshll.u32 %s1164_s25, 4  ;;  %s1035_s14 = int_to_ptr.vmem [resolvable:$false] %s1034_s14 }
 0x22e   : > { %s1036_s29 = scalar_lea.vmem %s1035_s14, 256  ;;  %p1037_p11 = scmp.lt.s32.totalorder %s568_s15, %s1035_s14 }
 0x22f   : > { %p1032_p5 = pnand %p1031_p2, %p1345_p10  ;;  %p1038_p9 = scmp.lt.s32.totalorder %s1036_s29, %s1030_s13 }
 0x230   : > { %s721_s8 = sshll.u32 %s1594_s27, 7 }
 0x231   : > { %s565_s12 = scalar_lea.hbm %s1595_s4, %s721_s8  ;;  %p1033_p7 = pneg %p1032_p5 }
 0x232   : > { %p1039_p0 = por %p1038_p9, %p1037_p11 }
 0x234   : > { %p1040_p6 = pnand %p1039_p0, %p1033_p7 }
 0x236   : > { %1043 = shalt.err (!%p1040_p6)
}
 0x237   : > { %s1044_s30 = scalar_lea.hbm %s565_s12, 128  ;;  %s1048_s9 = scalar_lea.hbm %s1595_s4, 256 }
 0x238   : > { %p1045_p8 = scmp.ne.s32.totalorder %s565_s12, %s1044_s30  ;;  %p1049_p13 = scmp.lt.s32.totalorder %s565_s12, %s1595_s4 }
 0x239   : > { %p1050_p1 = scmp.lt.s32.totalorder %s1048_s9, %s1044_s30 }
 0x23a   : > { %p1046_p4 = pnand %p1045_p8, %p1345_p10 }
 0x23b   : > { %p1051_p12 = por %p1050_p1, %p1049_p13 }
 0x23c   : > { %p1047_p3 = pneg %p1046_p4 }
 0x23e   : > { %p1052_p2 = pnand %p1051_p12, %p1047_p3 }
 0x240   : > { %1055 = shalt.err (!%p1052_p2)
}
 0x241   : > { %835 = dma.vmem_to_hbm [thread:$0]  (%p1345_p10), %s568_s15, 128, %s565_s12, %s554_s24  }
 0x242 PF: > { %p852_p5 = scmp.ge.s32.totalorder %s1154_s28, 2  ;;  %s579_s18 = sand.u32 1, %s1126_s21  }
 0x243   : > { %p1596_p7 = scmp.ne.s32.totalorder %s1585_s7, 0  ;;  %s580_s23 = scalar_lea.sflag [#allocation5], %s579_s18 }
 0x245   : > { %p848_p11 = pnand %p852_p5, %p1596_p7 }
 0x247   : > { %p849_p9 = pneg %p848_p11 }
 0x249   : > { %1109 = dma.done.wait (%p849_p9), %s580_s23, 128  }
 0x24a   : > { %1111 = vsyncadd (%p849_p9), %s580_s23, 4294967168  ;;  %s24_s28 = sadd.s32 1, %s1154_s28   ;;  %s1597_s11 = sld [smem:[#allocation18_spill]] }
 0x24b   : > { %p21_p0 = scmp.ge.s32.totalorder %s24_s28, 6   ;;  %s1598_s5 = sld [smem:[#allocation13_spill]] }
 0x24c   : > { %s1599_s23 = sld [smem:[#allocation19_spill]]  ;;  %s1603_s18 = smov %s1118_s19 }
 0x24d   : > { %s1600_s25 = sld [smem:[#allocation15_spill]]  ;;  %s1604_s19 = smov %s1122_s20 }
 0x24e   : > { %s1601_s2 = sld [smem:[#allocation16_spill]]  ;;  %s1606_s21 = smov %s1130_s22 }
 0x24f   : > { %s1602_s27 = sld [smem:[#allocation17_spill]]  ;;  %s1608_s24 = smov %s1146_s26 }
 0x250   : > { %s1605_s20 = smov %s1597_s11  ;;  %23 = sbr.rel (!%p21_p0) target bundleno = 17 (0x11), region = 124 }
 0x251   : > { %s1607_s22 = smov %s1598_s5 }
 0x254   : > { %s1609_s26 = smov %s1601_s2 }
 0x255   :  { %585 = vsyncpa [#allocation4], 1 }
 0x256   :  { %587 = vsyncpa [#allocation4 + $0x1], 1 }
 0x257   :  { %588 = vsyncpa [#allocation7], 1 }
 0x258   :  { %590 = vsyncpa [#allocation7 + $0x1], 1 }
 0x259   :  { %591 = vsyncpa [#allocation5], 1 }
 0x25a   :  { %593 = vsyncpa [#allocation5 + $0x1], 1 }

</bundles_post_ra>
